<compile_context>
chip_gen: v7x
topology: tpu7x:2x2x1
jax: 0.10.0
libtpu: 0.0.40
codegen_flags: <defaults>
</compile_context>

<pallas_src>
import functools

import jax
import jax.numpy as jnp
from jax.experimental import pallas as pl
from jax.experimental.pallas import tpu as pltpu


def _round_up(x, m):
    return ((x + m - 1) // m) * m


def _cdiv(a, b):
    return -(-a // b)


def _tpu_vmem_capacity_bytes():
    """Per-core VMEM capacity; conservative fallback if the query fails."""
    try:
        info = pltpu.get_tpu_info()
        cap = getattr(info, "vmem_capacity_bytes", None)
        if cap:
            return int(cap)
    except Exception:
        pass
    return 64 * 1024 * 1024  # v7x per-TC (smallest of v5e/v6e/v7x)


def _vmem_limit(est_bytes, cap_bytes):
    """Scoped-VMEM limit: headroom for Mosaic internals, <= ~60% of physical,
    never below the actual working-set estimate."""
    hi = max(int(cap_bytes * 0.6), est_bytes + (2 << 20))
    return int(min(max(est_bytes * 3 // 2 + (4 << 20), 16 << 20), hi))


def _choose_node_tile(n128, f_in_p, f_out_p, adj_isz, hid_isz, budget):
    """Largest node tile (multiple of 128) whose double-buffered working set
    fits the budget for both kernels."""
    best = 128
    for tn in (128, 256, 384, 512, 768, 1024):
        if tn > max(n128, 128):
            break
        need_hidden = (2 * tn * f_in_p * 4            # text tiles
                       + 2 * f_in_p * f_out_p * 4     # weight (resident)
                       + 2 * tn * f_out_p * hid_isz)  # hidden out tiles
        need_agg = (2 * tn * tn * adj_isz             # adjacency tiles
                    + 2 * tn * f_out_p * hid_isz      # hidden tiles
                    + 2 * tn * f_out_p * 4            # output tiles
                    + tn * f_out_p * 4                # f32 accumulator
                    + tn * 128 * 4                    # denom acc (lane-padded)
                    + 2 * f_out_p * 4)                # bias
        if max(need_hidden, need_agg) <= budget:
            best = tn
    return best


# ---------------------------------------------------------------------------
# Kernel 1: hidden = text @ W     (grid step = (batch, node-row-tile))
# ---------------------------------------------------------------------------
def _hidden_kernel(text_ref, w_ref, hid_ref, *, compute_dtype):
    x = text_ref[0]                                     # (TN, F_in_p)
    w = w_ref[...]                                      # (F_in_p, F_out_p)
    if jnp.dtype(compute_dtype) != jnp.dtype(jnp.float32):
        x = x.astype(compute_dtype)
        w = w.astype(compute_dtype)
    hid_ref[0] = jnp.dot(x, w, preferred_element_type=jnp.float32
                         ).astype(hid_ref.dtype)


# ---------------------------------------------------------------------------
# Kernel 2: out = relu((adj @ hidden) / (rowsum(adj) + 1) + bias)
#   grid = (batch, row-tile, k-tile); K (node contraction) is innermost,
#   "arbitrary", accumulating into VMEM scratch.
# ---------------------------------------------------------------------------
def _aggregate_kernel(adj_ref, hid_ref, b_ref, out_ref, acc_ref, den_ref, *,
                      use_activation, compute_dtype):
    k = pl.program_id(2)

    @pl.when(k == 0)
    def _():
        acc_ref[...] = jnp.zeros_like(acc_ref)
        den_ref[...] = jnp.zeros_like(den_ref)

    # int8 adjacency widened in vregs straight to the MXU input dtype; the
    # dominant (TN, TK) x (TK, F_out_p) matmul runs on the bf16 MXU path with
    # f32 accumulation.  No f32 copy of the adjacency tile is materialized.
    adj = adj_ref[0].astype(compute_dtype)                        # (TN, TK)
    acc_ref[...] += jnp.dot(adj, hid_ref[0],
                            preferred_element_type=jnp.float32)   # (TN, F_out_p)
    den_ref[...] += jnp.sum(adj, axis=1, dtype=jnp.float32, keepdims=True)

    @pl.when(k == pl.num_programs(2) - 1)
    def _():
        denom = den_ref[...] + 1.0                                # (TN, 1)
        # EUP approximate reciprocal + 2 Newton steps (~f32 accuracy).
        inv = pl.reciprocal(denom, approx=True)
        inv = inv * (2.0 - denom * inv)
        inv = inv * (2.0 - denom * inv)
        out = acc_ref[...] * inv + b_ref[...]
        if use_activation:
            out = jnp.maximum(out, 0.0)
        out_ref[0] = out.astype(out_ref.dtype)


# ---------------------------------------------------------------------------
# Wrapper
# ---------------------------------------------------------------------------
def graph_convolution(text, dep_adj, weight, bias=None, use_activation=True,
                      adj_dtype=jnp.int8, compute_dtype=jnp.bfloat16):
    """Pallas GCN layer forward (matches GraphConvolution.forward).

    text:    (B, N, F_in)  float32
    dep_adj: (B, N, N)     float32
    weight:  (F_in, F_out) float32
    bias:    (F_out,) or None

    adj_dtype:     HBM storage dtype for the adjacency stream.  The default
                   int8 is exact for 0/1 dependency edges (this module's
                   use case); pass jnp.bfloat16 / jnp.float32 for real-valued
                   edge weights.
    compute_dtype: MXU dtype for the two matmuls (f32 accumulation either
                   way).  Default bf16; pass jnp.float32 for an exact path
                   matching the f32 PyTorch reference.
    """
    B, N, F_in = text.shape
    F_out = weight.shape[1]

    if bias is None:
        bias = jnp.zeros((F_out,), dtype=jnp.float32)

    hid_dtype = (jnp.float32 if jnp.dtype(compute_dtype) == jnp.dtype(jnp.float32)
                 else jnp.dtype(compute_dtype))
    adj_isz = jnp.dtype(adj_dtype).itemsize
    hid_isz = jnp.dtype(hid_dtype).itemsize

    # ---- geometry: 128-aligned feature dims, node dim tiled in TN ----------
    F_in_p = _round_up(F_in, 128)
    F_out_p = _round_up(F_out, 128)
    N128 = _round_up(N, 128)

    vmem_cap = _tpu_vmem_capacity_bytes()
    TN = _choose_node_tile(N128, F_in_p, F_out_p, adj_isz, hid_isz,
                           budget=vmem_cap // 4)
    TN = min(TN, N128)
    n_tiles = _cdiv(N128, TN)
    N_p = TN * n_tiles
    # TODO(synk): K-tile F_in in the hidden kernel (extra grid axis + f32
    # accumulator) if the resident (F_in_p, F_out_p) weight block alone ever
    # exceeds the VMEM budget; typical GCN widths fit comfortably.

    # ---- pad operands (zeros keep semantics exact) --------------------------
    text_p = jnp.pad(text.astype(jnp.float32),
                     ((0, 0), (0, N_p - N), (0, F_in_p - F_in)))
    adj_p = jnp.pad(dep_adj.astype(adj_dtype),
                    ((0, 0), (0, N_p - N), (0, N_p - N)))
    w_p = jnp.pad(weight.astype(jnp.float32),
                  ((0, F_in_p - F_in), (0, F_out_p - F_out)))
    b_p = jnp.pad(bias.astype(jnp.float32),
                  (0, F_out_p - F_out)).reshape(1, F_out_p)

    # ======================= call 1: hidden = text @ W ======================
    hid_est = (2 * TN * F_in_p * 4
               + 2 * F_in_p * F_out_p * 4
               + 2 * TN * F_out_p * hid_isz)
    hid_cost = pl.CostEstimate(
        flops=2 * B * N_p * F_in_p * F_out_p,
        transcendentals=0,
        bytes_accessed=(B * N_p * F_in_p * 4 + F_in_p * F_out_p * 4
                        + B * N_p * F_out_p * hid_isz))

    hidden = pl.pallas_call(
        functools.partial(_hidden_kernel, compute_dtype=compute_dtype),
        out_shape=jax.ShapeDtypeStruct((B, N_p, F_out_p), hid_dtype),
        grid_spec=pltpu.PrefetchScalarGridSpec(
            num_scalar_prefetch=0,
            grid=(B, n_tiles),
            in_specs=[
                pl.BlockSpec((1, TN, F_in_p), lambda b, r: (b, r, 0)),
                pl.BlockSpec((F_in_p, F_out_p), lambda b, r: (0, 0)),
            ],
            out_specs=pl.BlockSpec((1, TN, F_out_p), lambda b, r: (b, r, 0)),
        ),
        compiler_params=pltpu.CompilerParams(
            dimension_semantics=("parallel", "parallel"),
            vmem_limit_bytes=_vmem_limit(hid_est, vmem_cap),
        ),
        cost_estimate=hid_cost,
    )(text_p, w_p)

    # ============== call 2: out = relu((adj @ hidden)/denom + b) ============
    agg_est = (2 * TN * TN * adj_isz
               + 2 * TN * F_out_p * hid_isz
               + 2 * TN * F_out_p * 4
               + TN * F_out_p * 4
               + TN * 128 * 4
               + 2 * F_out_p * 4)
    agg_cost = pl.CostEstimate(
        flops=2 * B * N_p * N_p * F_out_p,
        transcendentals=B * N_p,
        bytes_accessed=(B * N_p * N_p * adj_isz
                        + B * n_tiles * N_p * F_out_p * hid_isz
                        + B * N_p * F_out_p * 4 + F_out_p * 4))

    # TODO(synk): on v5e, if a profile shows exposed adjacency DMA, add
    # pipeline_mode=pl.Buffered(3) to the adjacency BlockSpec below.
    out_p = pl.pallas_call(
        functools.partial(_aggregate_kernel, use_activation=use_activation,
                          compute_dtype=compute_dtype),
        out_shape=jax.ShapeDtypeStruct((B, N_p, F_out_p), jnp.float32),
        grid_spec=pltpu.PrefetchScalarGridSpec(
            num_scalar_prefetch=0,
            grid=(B, n_tiles, n_tiles),
            in_specs=[
                pl.BlockSpec((1, TN, TN), lambda b, r, k: (b, r, k)),
                pl.BlockSpec((1, TN, F_out_p), lambda b, r, k: (b, k, 0)),
                pl.BlockSpec((1, F_out_p), lambda b, r, k: (0, 0)),
            ],
            out_specs=pl.BlockSpec((1, TN, F_out_p), lambda b, r, k: (b, r, 0)),
            scratch_shapes=[pltpu.VMEM((TN, F_out_p), jnp.float32),
                            pltpu.VMEM((TN, 1), jnp.float32)],
        ),
        compiler_params=pltpu.CompilerParams(
            dimension_semantics=("parallel", "parallel", "arbitrary"),
            vmem_limit_bytes=_vmem_limit(agg_est, vmem_cap),
        ),
        cost_estimate=agg_cost,
    )(adj_p, hidden, b_p)

    # Drop node / feature padding.
    return out_p[:, :N, :F_out]


def _reference(text, dep_adj, weight, bias, use_activation=True):
    hidden = jnp.matmul(text, weight)
    denom = jnp.sum(dep_adj, axis=2, keepdims=True) + 1.0
    out = jnp.matmul(dep_adj, hidden) / denom
    if bias is not None:
        out = out + bias
    if use_activation:
        out = jnp.maximum(out, 0.0)
    return out


if __name__ == "__main__":
    # Small shapes consistent with the module's forward.
    B, N, F_in, F_out = 2, 8, 32, 32

    key = jax.random.PRNGKey(0)
    k_text, k_adj, k_w, k_b = jax.random.split(key, 4)

    text = jax.random.normal(k_text, (B, N, F_in), dtype=jnp.float32)
    # 0/1 dependency adjacency with self-loops (exactly representable in int8).
    raw = jax.random.uniform(k_adj, (B, N, N), dtype=jnp.float32)
    dep_adj = ((raw > 0.5).astype(jnp.float32)
               + jnp.broadcast_to(jnp.eye(N, dtype=jnp.float32), (B, N, N)))
    dep_adj = jnp.minimum(dep_adj, 1.0)

    weight = jax.random.normal(k_w, (F_in, F_out), dtype=jnp.float32) * (1.0 / F_in ** 0.5)
    bias = jax.random.normal(k_b, (F_out,), dtype=jnp.float32) * 0.01

    ref = _reference(text, dep_adj, weight, bias, use_activation=True)

    # Fast path: int8 adjacency stream + bf16 MXU (f32 accumulation).
    out = graph_convolution(text, dep_adj, weight, bias, use_activation=True)
    out = jax.block_until_ready(out)
    assert out.shape == (B, N, F_out)
    assert jnp.allclose(out, ref, atol=2e-2, rtol=2e-2), "bf16 path mismatch"

    # Exact path: f32 storage + f32 MXU, matches the PyTorch f32 reference.
    out_f32 = graph_convolution(text, dep_adj, weight, bias,
                                use_activation=True,
                                adj_dtype=jnp.float32,
                                compute_dtype=jnp.float32)
    out_f32 = jax.block_until_ready(out_f32)
    assert jnp.allclose(out_f32, ref, atol=1e-4, rtol=1e-4), "f32 path mismatch"

    print("KERNEL_OK")
</pallas_src>

<mosaic_0001>
module attributes {stable_mosaic.version = 11 : i64} {
  func.func @_hidden_kernel(%arg0: i32, %arg1: i32, %arg2: memref<1x128x128xf32, #tpu.memory_space<vmem>>, %arg3: memref<128x128xf32, #tpu.memory_space<vmem>>, %arg4: memref<1x128x128xbf16, #tpu.memory_space<vmem>>) attributes {dimension_semantics = [#tpu.dimension_semantics<parallel>, #tpu.dimension_semantics<parallel>], iteration_bounds = array<i64: 2, 1>, scalar_prefetch = 0 : i64, scratch_operands = 0 : i64, tpu.core_type = #tpu.core_type<tc>, window_params = [{transform_indices = @transform_0, window_bounds = array<i64: 1, 128, 128>}, {pipeline_mode = #tpu.pipeline_mode<synchronous>, transform_indices = @transform_1, window_bounds = array<i64: 128, 128>}, {transform_indices = @transform_2, window_bounds = array<i64: 1, 128, 128>}]} {
    %c0 = arith.constant 0 : index
    %c0_0 = arith.constant 0 : index
    %c0_1 = arith.constant 0 : index
    %0 = vector.load %arg2[%c0, %c0_0, %c0_1] : memref<1x128x128xf32, #tpu.memory_space<vmem>>, vector<1x128x128xf32>
    %1 = vector.shape_cast %0 : vector<1x128x128xf32> to vector<128x128xf32>
    %c0_2 = arith.constant 0 : index
    %c0_3 = arith.constant 0 : index
    %2 = vector.load %arg3[%c0_2, %c0_3] : memref<128x128xf32, #tpu.memory_space<vmem>>, vector<128x128xf32>
    %3 = arith.truncf %1 : vector<128x128xf32> to vector<128x128xbf16>
    %4 = arith.truncf %2 : vector<128x128xf32> to vector<128x128xbf16>
    %cst = arith.constant dense<0.000000e+00> : vector<128x128xf32>
    %5 = tpu.matmul %3, %4, %cst {dimension_numbers = #tpu.dot_dimension_numbers<[1], [0], [0], [1], [0, 0, 1, 1], [], []>} : vector<128x128xbf16>, vector<128x128xbf16>, vector<128x128xf32> -> vector<128x128xf32>
    %6 = arith.truncf %5 : vector<128x128xf32> to vector<128x128xbf16>
    %c0_4 = arith.constant 0 : index
    %c0_5 = arith.constant 0 : index
    %c0_6 = arith.constant 0 : index
    %7 = vector.load %arg4[%c0_4, %c0_5, %c0_6] : memref<1x128x128xbf16, #tpu.memory_space<vmem>>, vector<1x128x128xbf16>
    %8 = vector.shape_cast %7 : vector<1x128x128xbf16> to vector<128x128xbf16>
    %9 = vector.shape_cast %6 : vector<128x128xbf16> to vector<1x128x128xbf16>
    tpu.vector_store %arg4[%c0_4, %c0_5, %c0_6], %9 {strides = array<i32>} : memref<1x128x128xbf16, #tpu.memory_space<vmem>>, vector<1x128x128xbf16>,
    return
  }
  func.func @transform_0(%arg0: i32, %arg1: i32) -> (i32, i32, i32) {
    %c0_i32 = arith.constant 0 : i32
    %c0_i32_0 = arith.constant 0 : i32
    return %arg0, %arg1, %c0_i32 : i32, i32, i32
  }
  func.func @transform_1(%arg0: i32, %arg1: i32) -> (i32, i32) {
    %c0_i32 = arith.constant 0 : i32
    %c0_i32_0 = arith.constant 0 : i32
    %c0_i32_1 = arith.constant 0 : i32
    return %c0_i32, %c0_i32_0 : i32, i32
  }
  func.func @transform_2(%arg0: i32, %arg1: i32) -> (i32, i32, i32) {
    %c0_i32 = arith.constant 0 : i32
    %c0_i32_0 = arith.constant 0 : i32
    return %arg0, %arg1, %c0_i32 : i32, i32, i32
  }
}

</mosaic_0001>

<bundles_post_ra>
// kernel: tpu_custom_call.1
= control target key start
LH: loop header
LB: loop body
LE: loop exit
PB: predicated region body
PF: predicated region fallthrough
CT: control target
= control target key end

     0   :  { %7 = vsyncpa [#allocation3], 0  ;;  %s1187_s0 = inlined_call_operand.hbm [shape: f32[2,128,128], index: 0, kind: input, shape index: {}]   ;;  %s1188_s1 = inlined_call_operand.hbm [shape: f32[128,128], index: 1, kind: input, shape index: {}]   ;;  %s1189_s2 = inlined_call_operand.hbm [shape: bf16[2,128,128], index: 2, kind: output, shape index: {}]  }
   0x1   :  { %9 = vsyncpa [#allocation3 + $0x1], 0 }
   0x2   :  { %10 = vsyncpa [#allocation6], 0 }
   0x3   :  { %11 = vsyncpa [#allocation4], 0 }
   0x4   :  { %13 = vsyncpa [#allocation4 + $0x1], 0  ;;  %s943_s9 = smov 0   ;;  %s945_s10 = smov 0  }
   0x5   :  { %s947_s11 = smov 0   ;;  %s949_s12 = smov 0  }
   0x6   :  { %s951_s13 = smov 0   ;;  %s953_s14 = smov 0  }
   0x7 LB: > { %s536_s15 = sadd.s32 4294967295, %s919_s14   ;;  %s537_s16 = sadd.s32 4294967294, %s919_s14   ;;  %s919_s14 = sphi %s953_s14, %s19_s14   ;;  %s915_s13 = sphi %s951_s13, %s1213_s13   ;;  %s911_s12 = sphi %s949_s12, %s1212_s12   ;;  %s907_s11 = sphi %s947_s11, %s1211_s11   ;;  %s903_s10 = sphi %s945_s10, %s1210_s10   ;;  %s899_s9 = sphi %s943_s9, %s1209_s9  }
   0x8   : > { %p53_p0 = scmp.ne.s32.totalorder %s903_s10, %s899_s9  ;;  %p977_p1 = scmp.eq.s32.totalorder %s536_s15, 0 }
   0x9   : > { %p981_p2 = scmp.eq.s32.totalorder %s536_s15, 1  ;;  %p106_p3 = scmp.eq.s32.totalorder %s537_s16, 1 }
   0xa   : > { %s1194_s17 = scalar_select %p977_p1, 1, 0 }
   0xb   : > { %s1195_s18 = scalar_select %p981_p2, 1, 0 }
   0xc   : > { %p987_p4 = por %p977_p1, %p53_p0  ;;  %p538_p5 = scmp.ge.s32.totalorder %s919_s14, 1 }
   0xd   : > { %p992_p6 = por %p106_p3, %p53_p0  ;;  %p113_p7 = scmp.lt.s32.totalorder %s919_s14, 3 }
   0xe   : > { %s1196_s19 = scalar_select %p987_p4, 1, 0 }
   0xf   : > { %s1197_s20 = scalar_select %p992_p6, 1, 0 }
  0x10   : > { %p997_p8 = pnand %p538_p5, %p113_p7  ;;  %s921_s22 = smov [#allocation5]  }
  0x11   : > { %s125_s23 = sshll.u32 %s921_s22, 4  ;;  %s31_s25 = sadd.s32 1, %s915_s13  ;;  %s126_s23 = int_to_ptr.vmem [resolvable:$true] %s125_s23 }
  0x12   : > { %s1198_s21 = scalar_select %p997_p8, 1, 0 }
  0x13   : > { %p706_p9 = pneg %p997_p8  ;;  %s775_s28 = scalar_lea.hbm %s1188_s1, 2048 }
  0x14   : > { %p776_p12 = scmp.ne.s32.totalorder %s1188_s1, %s775_s28  ;;  %p782_p5 = scmp.lt.u32.totalorder %s775_s28, %s1188_s1 }
  0x15   : > { %p1006_p11 = pnand %p706_p9, %p977_p1 }
  0x17   : > { %p777_p13 = pneg %p1006_p11 }
  0x19   : > { %p778_p0 = pnand %p777_p13, %p776_p12 }
  0x1b   : > { %p779_p3 = pneg %p778_p0 }
  0x1d   : > { %p784_p7 = pnand %p782_p5, %p779_p3 }
  0x1f   : > { %787 = shalt.err (!%p784_p7)
}
  0x20   : > { %s788_s5 = scalar_lea.vmem %s126_s23, 2048  ;;  %p796_p1 = scmp.lt.s32.totalorder %s126_s23, %s126_s23 }
  0x21   : > { %p789_p9 = scmp.ne.s32.totalorder %s126_s23, %s788_s5  ;;  %p797_p4 = scmp.lt.s32.totalorder %s788_s5, %s788_s5 }
  0x23   : > { %p791_p10 = pnand %p789_p9, %p777_p13  ;;  %p798_p8 = por %p797_p4, %p796_p1 }
  0x25   : > { %p792_p6 = pneg %p791_p10 }
  0x27   : > { %p799_p2 = pnand %p798_p8, %p792_p6 }
  0x29   : > { %802 = shalt.err (!%p799_p2)
}
  0x2a   : > { %s922_s6 = smov 128   ;;  %s923_s7 = smov 8  }
  0x2b   : > { %709 = dma.hbm_to_vmem [thread:$0]  (!%p1006_p11), %s1188_s1, 2048, %s126_s23, [#allocation6], %s922_s6, %s922_s6, %s923_s7  }
  0x2c   : > { %p33_p1 = scmp.ge.s32.totalorder %s31_s25, 2  ;;  %s40_s16 = sadd.s32 1, %s907_s11 }
  0x2d   : > { %p47_p2 = scmp.ne.s32.totalorder %s907_s11, %s903_s10  ;;  %p48_p4 = scmp.eq.s32.totalorder %s919_s14, 0 }
  0x2e   : > { %s1215_s25 = smov (%p33_p1, %s31_s25), 0  ;;  %p1201_p8 = scmp.ne.s32.totalorder %s1195_s18, 0 }
  0x2f   : > { %p1036_p6 = por %p48_p4, %p47_p2  ;;  %s35_s26 = ssub.s32 %s915_s13, %s1215_s25 }
  0x30   : > { %p1042_p10 = por %p1201_p8, %p47_p2  ;;  %p719_p12 = scmp.lt.s32.totalorder %s919_s14, 2 }
  0x31   : > { %p38_p11 = scmp.eq.s32.totalorder %s35_s26, 0  ;;  %s139_s23 = sand.u32 1, %s907_s11  }
  0x32   : > { %s541_s27 = sshll.u32 %s139_s23, 7  ;;  %s569_s29 = sshll.u32 %s915_s13, 11 }
  0x33   : > { %s1051_s28 = scalar_select %p38_p11, %s907_s11, %s40_s16  }
  0x34   : > { %s1057_s4 = scalar_lea.hbm %s1187_s0, %s569_s29  ;;  %s143_s18 = scalar_lea.vmem [#allocation2], %s541_s27 }
  0x35   : > { %s152_s5 = sshll.u32 %s143_s18, 4  ;;  %p1063_p13 = pnand %p719_p12, %p1036_p6  ;;  %s1059_s5 = int_to_ptr.vmem [resolvable:$true] %s152_s5 }
  0x36   : > { %s1067_s15 = scalar_lea.sflag [#allocation3], %s139_s23  ;;  %s803_s16 = scalar_lea.hbm %s1057_s4, 2048 }
  0x37   : > { %p804_p0 = scmp.ne.s32.totalorder %s1057_s4, %s803_s16  ;;  %p805_p3 = pneg %p1063_p13 }
  0x38   : > { %s808_s22 = scalar_lea.hbm %s1187_s0, 4096  ;;  %p809_p9 = scmp.lt.u32.totalorder %s1057_s4, %s1187_s0 }
  0x39   : > { %p806_p5 = pnand %p805_p3, %p804_p0  ;;  %p810_p1 = scmp.lt.u32.totalorder %s808_s22, %s803_s16 }
  0x3a   : > { %p812_p4 = scmp.lt.u32.totalorder %s803_s16, %s1057_s4 }
  0x3b   : > { %p807_p7 = pneg %p806_p5  ;;  %p811_p2 = por %p810_p1, %p809_p9 }
  0x3d   : > { %p813_p6 = por %p812_p4, %p811_p2 }
  0x3f   : > { %p814_p8 = pnand %p813_p6, %p807_p7 }
  0x41   : > { %817 = shalt.err (!%p814_p8)
}
  0x42   : > { %s818_s23 = scalar_lea.vmem %s1059_s5, 2048  ;;  %s924_s3 = smov [#allocation2]  }
  0x43   : > { %p819_p12 = scmp.ne.s32.totalorder %s1059_s5, %s818_s23  ;;  %s823_s18 = sshll.u32 %s924_s3, 4  ;;  %s824_s18 = int_to_ptr.vmem [resolvable:$false] %s823_s18 }
  0x44   : > { %s825_s26 = scalar_lea.vmem %s824_s18, 4096  ;;  %p826_p5 = scmp.lt.s32.totalorder %s1059_s5, %s824_s18 }
  0x45   : > { %p821_p11 = pnand %p819_p12, %p805_p3  ;;  %p827_p9 = scmp.lt.s32.totalorder %s825_s26, %s818_s23 }
  0x47   : > { %p822_p0 = pneg %p821_p11  ;;  %p828_p1 = por %p827_p9, %p826_p5 }
  0x49   : > { %p829_p2 = pnand %p828_p1, %p822_p0 }
  0x4b   : > { %832 = shalt.err (!%p829_p2)
}
  0x4c   : > { %713 = dma.hbm_to_vmem [thread:$0]  (!%p1063_p13), %s1057_s4, 2048, %s1059_s5, %s1067_s15, %s922_s6, %s922_s6, %s923_s7  }
  0x4d   : > { %p1204_p3 = scmp.ne.s32.totalorder %s1198_s21, 0 }
  0x4e   : > { %s1101_s16 = sand.u32 (!%p1204_p3), 1, %s903_s10   ;;  %p1205_p7 = scmp.ne.s32.totalorder (!%p1204_p3), %s1196_s19, 0 }
  0x4f   : > { %164 = sbr.rel (%p1204_p3) target bundleno = 365 (0x16d), region = 28  ;;  %s545_s27 = sshll.u32 (!%p1204_p3), %s1101_s16, 7 }
  0x50   : > { %s167_s22 = scalar_lea.sflag (!%p1204_p3), [#allocation3], %s1101_s16  ;;  %s1105_s29 = scalar_lea.vmem (!%p1204_p3), [#allocation2], %s545_s27 }
  0x56   : > { %886 = dma.done.wait (%p1205_p7), %s167_s22, 2048  }
  0x57   : > { %888 = vsyncadd (%p1205_p7), %s167_s22, 4294965248  ;;  %p1206_p13 = scmp.ne.s32.totalorder %s1194_s17, 0 }
  0x59   : > { %890 = dma.done.wait (%p1206_p13), [#allocation6], 2048  }
  0x5a   : > { %892 = vsyncadd (%p1206_p13), [#allocation6], 4294965248  ;;  %v214_v0 = vld [vmem:[#allocation5] sm:$0xff]  ;;  %v215_v1 = vld [vmem:[#allocation5 + $0x8] sm:$0xff]  ;;  %s547_s17 = sshll.u32 %s1101_s16, 6  ;;  %s586_s6 = sshll.u32 %s911_s12, 10 }
  0x5b   : > { %v216_v2 = vld [vmem:[#allocation5 + $0x10] sm:$0xff]  ;;  %v238_v3 = vpack.c.bf16 %v215_v1, %v214_v0  ;;  %v217_v4 = vld [vmem:[#allocation5 + $0x18] sm:$0xff]  ;;  %v218_v6 = vld [vmem:[#allocation5 + $0x20] sm:$0xff]  ;;  %s194_s19 = scalar_lea.vmem [#allocation7], %s547_s17  ;;  %s1138_s5 = scalar_lea.hbm %s1189_s2, %s586_s6 }
  0x5c   : > { %v239_v5 = vpack.c.bf16 %v217_v4, %v216_v2  ;;  %v219_v7 = vld [vmem:[#allocation5 + $0x28] sm:$0xff]  ;;  %v220_v9 = vld [vmem:[#allocation5 + $0x30] sm:$0xff]  ;;  %v198_v10 = vld [vmem:[%s1105_s29] sm:$0xff]  ;;  %s439_s21 = sshll.u32 %s194_s19, 4  ;;  %s424_s12 = scalar_lea.sflag [#allocation4], %s1101_s16  ;;  %s1133_s21 = int_to_ptr.vmem [resolvable:$true] %s439_s21 }
  0x5d   : > { %650 = vmatprep.subr.bf16.mxu0 %v238_v3  ;;  %682 = vmatprep.subr.bf16.mxu1 %v238_v3  ;;  %v240_v8 = vpack.c.bf16 %v219_v7, %v218_v6  ;;  %v199_v11 = vld [vmem:[%s1105_s29 + $0x8] sm:$0xff]  ;;  %v221_v12 = vld [vmem:[#allocation5 + $0x38] sm:$0xff]  ;;  %v206_v14 = vld [vmem:[%s1105_s29 + $0x40] sm:$0xff]  ;;  %s833_s8 = scalar_lea.vmem %s1133_s21, 1024  ;;  %s925_s15 = smov [#allocation7]  }
  0x5e   : > { %651 = vmatpush3.bf16.msra.mxu0 %v238_v3  ;;  %690 = vmatpush3.bf16.msra.mxu1 %v238_v3  ;;  %v230_v13 = vpack.c.bf16 %v199_v11, %v198_v10  ;;  %v207_v15 = vld [vmem:[%s1105_s29 + $0x48] sm:$0xff]  ;;  %v241_v17 = vpack.c.bf16 %v221_v12, %v220_v9  ;;  %v222_v18 = vld [vmem:[#allocation5 + $0x40] sm:$0xff]  ;;  %v224_v21 = vld [vmem:[#allocation5 + $0x50] sm:$0xff]  ;;  %p834_p4 = scmp.ne.s32.totalorder %s1133_s21, %s833_s8  ;;  %s837_s30 = sshll.u32 %s925_s15, 4  ;;  %s838_s30 = int_to_ptr.vmem [resolvable:$false] %s837_s30 }
  0x5f   : > { %652 = vmatprep.subr.bf16.mxu0 %v239_v5  ;;  %683 = vmatprep.subr.bf16.mxu1 %v239_v5  ;;  %v234_v16 = vpack.c.bf16 %v207_v15, %v206_v14  ;;  %v223_v19 = vld [vmem:[#allocation5 + $0x48] sm:$0xff]  ;;  %v225_v22 = vld [vmem:[#allocation5 + $0x58] sm:$0xff]  ;;  %v226_v24 = vld [vmem:[#allocation5 + $0x60] sm:$0xff]  ;;  %s839_s23 = scalar_lea.vmem %s838_s30, 2048  ;;  %p840_p12 = scmp.lt.s32.totalorder %s1133_s21, %s838_s30 }
  0x60   : > { %666 = vmatprep.mubr.bf16.mxu0 %v230_v13  ;;  %v242_v20 = vpack.c.bf16 %v223_v19, %v222_v18  ;;  %v243_v23 = vpack.c.bf16 %v225_v22, %v224_v21  ;;  %v227_v25 = vld [vmem:[#allocation5 + $0x68] sm:$0xff]  ;;  %v228_v27 = vld [vmem:[#allocation5 + $0x70] sm:$0xff]  ;;  %v229_v28 = vld [vmem:[#allocation5 + $0x78] sm:$0xff]  ;;  %p835_p6 = pnand %p834_p4, %p1042_p10  ;;  %p841_p11 = scmp.lt.s32.totalorder %s839_s23, %s833_s8 }
  0x61   : > { %674 = vmatprep.mubr.bf16.mxu1 %v234_v16  ;;  %v244_v26 = vpack.c.bf16 %v227_v25, %v226_v24  ;;  %v245_v29 = vpack.c.bf16 %v229_v28, %v228_v27  ;;  %v200_v30 = vld [vmem:[%s1105_s29 + $0x10] sm:$0xff]  ;;  %v201_v31 = vld [vmem:[%s1105_s29 + $0x18] sm:$0xff]  ;;  %v202_v34 = vld [vmem:[%s1105_s29 + $0x20] sm:$0xff] }
  0x62   : > { %653 = vmatpush3.bf16.msra.mxu0 %v239_v5  ;;  %691 = vmatpush3.bf16.msra.mxu1 %v239_v5  ;;  %v208_v32 = vld [vmem:[%s1105_s29 + $0x50] sm:$0xff]  ;;  %v209_v33 = vld [vmem:[%s1105_s29 + $0x58] sm:$0xff]  ;;  %v203_v35 = vld [vmem:[%s1105_s29 + $0x28] sm:$0xff]  ;;  %v231_v38 = vpack.c.bf16 %v201_v31, %v200_v30  ;;  %p836_p8 = pneg %p835_p6  ;;  %p842_p0 = por %p841_p11, %p840_p12 }
  0x63   : > { %654 = vmatprep.subr.bf16.mxu0 %v240_v8  ;;  %684 = vmatprep.subr.bf16.mxu1 %v240_v8  ;;  %v210_v36 = vld [vmem:[%s1105_s29 + $0x60] sm:$0xff]  ;;  %v211_v37 = vld [vmem:[%s1105_s29 + $0x68] sm:$0xff]  ;;  %v235_v39 = vpack.c.bf16 %v209_v33, %v208_v32  ;;  %v232_v40 = vpack.c.bf16 %v203_v35, %v202_v34  ;;  %v204_v42 = vld [vmem:[%s1105_s29 + $0x30] sm:$0xff] }
  0x64   : > { %v236_v41 = vpack.c.bf16 %v211_v37, %v210_v36  ;;  %v205_v43 = vld [vmem:[%s1105_s29 + $0x38] sm:$0xff]  ;;  %v212_v44 = vld [vmem:[%s1105_s29 + $0x70] sm:$0xff]  ;;  %p843_p5 = pnand %p842_p0, %p836_p8 }
  0x65   : > { %v213_v45 = vld [vmem:[%s1105_s29 + $0x78] sm:$0xff]  ;;  %v233_v46 = vpack.c.bf16 %v205_v43, %v204_v42 }
  0x66   : > { %655 = vmatpush3.bf16.msra.mxu0 %v240_v8  ;;  %692 = vmatpush3.bf16.msra.mxu1 %v240_v8  ;;  %v237_v47 = vpack.c.bf16 %v213_v45, %v212_v44 }
  0x67   : > { %656 = vmatprep.subr.bf16.mxu0 %v241_v17  ;;  %685 = vmatprep.subr.bf16.mxu1 %v241_v17 }
  0x6a   : > { %657 = vmatpush3.bf16.msra.mxu0 %v241_v17  ;;  %693 = vmatpush3.bf16.msra.mxu1 %v241_v17 }
  0x6b   : > { %658 = vmatprep.subr.bf16.mxu0 %v242_v20  ;;  %686 = vmatprep.subr.bf16.mxu1 %v242_v20 }
  0x6e   : > { %659 = vmatpush3.bf16.msra.mxu0 %v242_v20  ;;  %694 = vmatpush3.bf16.msra.mxu1 %v242_v20 }
  0x6f   : > { %660 = vmatprep.subr.bf16.mxu0 %v243_v23  ;;  %687 = vmatprep.subr.bf16.mxu1 %v243_v23 }
  0x72   : > { %661 = vmatpush3.bf16.msra.mxu0 %v243_v23  ;;  %695 = vmatpush3.bf16.msra.mxu1 %v243_v23 }
  0x73   : > { %662 = vmatprep.subr.bf16.mxu0 %v244_v26  ;;  %688 = vmatprep.subr.bf16.mxu1 %v244_v26 }
  0x76   : > { %663 = vmatpush3.bf16.msra.mxu0 %v244_v26  ;;  %696 = vmatpush3.bf16.msra.mxu1 %v244_v26 }
  0x77   : > { %664 = vmatprep.subr.bf16.mxu0 %v245_v29  ;;  %689 = vmatprep.subr.bf16.mxu1 %v245_v29 }
  0x7a   : > { %665 = vmatpush3.bf16.msra.mxu0 %v245_v29  ;;  %697 = vmatpush3.bf16.msra.mxu1 %v245_v29 }
  0x7d   : > { %667 = vmatmul.mubr.bf16.vlgmr.msra.gmra.mrb[0].mxu0 %v231_v38  ;;  %675 = vmatmul.mubr.bf16.vlgmr.msra.gmra.mrb[0].mxu1 %v235_v39 }
  0x7e   : > { %670 = vmatprep.mubr.bf16.mxu0 %v232_v40  ;;  %678 = vmatprep.mubr.bf16.mxu1 %v236_v41 }
  0x85   : > { %671 = vmatmul.mubr.bf16.gmra.mrb[4].mxu0 %v233_v46  ;;  %679 = vmatmul.mubr.bf16.gmra.mrb[4].mxu1 %v237_v47 }
 0x150   : > { %v668_v48 = vpop.f32.mrb[0].mxu0  ;;  %v676_v49 = vpop.f32.mrb[0].mxu1 }
 0x151   : > { %v280_v50 = vpop.f32.mrb[1].mxu0  ;;  %v312_v51 = vpop.f32.mrb[1].mxu1 }
 0x152   : > { %v669_v52 = vpop.f32.mrb[2].mxu0  ;;  %v677_v53 = vpop.f32.mrb[2].mxu1 }
 0x153   : > { %v595_v54 = vpack.c.bf16 %v669_v52, %v668_v48  ;;  %v615_v55 = vpack.c.bf16 %v677_v53, %v676_v49  ;;  %v283_v56 = vpop.f32.mrb[3].mxu0  ;;  %v315_v57 = vpop.f32.mrb[3].mxu1 }
 0x154   : > { %v590_v58 = vpack.c.bf16 %v283_v56, %v280_v50  ;;  %v610_v59 = vpack.c.bf16 %v315_v57, %v312_v51 }
 0x155   : > { %627 = vst [vmem:[%s194_s19 + $0x8] sm:$0xff] %v595_v54   ;;  %631 = vst [vmem:[%s194_s19 + $0x28] sm:$0xff] %v615_v55  }
 0x156   : > { %591 = vst [vmem:[%s194_s19] sm:$0xff] %v590_v58   ;;  %630 = vst [vmem:[%s194_s19 + $0x20] sm:$0xff] %v610_v59  }
 0x158   : > { %v672_v60 = vpop.f32.mrb[4].mxu0  ;;  %v680_v61 = vpop.f32.mrb[4].mxu1 }
 0x159   : > { %v296_v62 = vpop.f32.mrb[5].mxu0  ;;  %v328_v63 = vpop.f32.mrb[5].mxu1 }
 0x15a   : > { %v673_v0 = vpop.f32.mrb[6].mxu0  ;;  %v681_v1 = vpop.f32.mrb[6].mxu1 }
 0x15b   : > { %v605_v2 = vpack.c.bf16 %v673_v0, %v672_v60  ;;  %v625_v3 = vpack.c.bf16 %v681_v1, %v680_v61  ;;  %v299_v4 = vpop.f32.mrb[7].mxu0  ;;  %v331_v5 = vpop.f32.mrb[7].mxu1 }
 0x15c   : > { %v600_v6 = vpack.c.bf16 %v299_v4, %v296_v62  ;;  %v620_v7 = vpack.c.bf16 %v331_v5, %v328_v63 }
 0x15d   : > { %629 = vst [vmem:[%s194_s19 + $0x18] sm:$0xff] %v605_v2   ;;  %633 = vst [vmem:[%s194_s19 + $0x38] sm:$0xff] %v625_v3  }
 0x15e   : > { %628 = vst [vmem:[%s194_s19 + $0x10] sm:$0xff] %v600_v6   ;;  %632 = vst [vmem:[%s194_s19 + $0x30] sm:$0xff] %v620_v7  }
 0x15f   : > { %846 = shalt.err (!%p843_p5)
}
 0x160   : > { %s847_s3 = scalar_lea.hbm %s1138_s5, 1024  ;;  %s851_s27 = scalar_lea.hbm %s1189_s2, 2048 }
 0x161   : > { %p848_p9 = scmp.ne.s32.totalorder %s1138_s5, %s847_s3  ;;  %p852_p3 = scmp.lt.u32.totalorder %s1138_s5, %s1189_s2 }
 0x162   : > { %p853_p7 = scmp.lt.u32.totalorder %s851_s27, %s847_s3  ;;  %p855_p4 = scmp.lt.u32.totalorder %s847_s3, %s1138_s5 }
 0x163   : > { %p849_p1 = pnand %p848_p9, %p1042_p10 }
 0x164   : > { %p854_p13 = por %p853_p7, %p852_p3 }
 0x165   : > { %p850_p2 = pneg %p849_p1 }
 0x166   : > { %p856_p6 = por %p855_p4, %p854_p13 }
 0x168   : > { %p857_p8 = pnand %p856_p6, %p850_p2 }
 0x16a   : > { %860 = shalt.err (!%p857_p8)
}
 0x16b   : > { %s926_s17 = smov 64   ;;  %s927_s19 = smov 4  }
 0x16c   : > { %704 = dma.vmem_to_hbm [thread:$0]  (%p1042_p10), %s1133_s21, 1024, %s1138_s5, %s424_s12, %s926_s17, %s926_s17, %s927_s19  }
 0x16d PF: > { %s454_s6 = sand.u32 1, %s899_s9   ;;  %p1207_p12 = scmp.ne.s32.totalorder %s1197_s20, 0 }
 0x16e   : > { %p1208_p11 = scmp.ge.s32.totalorder %s919_s14, 2  ;;  %s455_s7 = scalar_lea.sflag [#allocation4], %s454_s6 }
 0x170   : > { %p715_p0 = pnand %p1208_p11, %p1207_p12 }
 0x172   : > { %894 = dma.done.wait (!%p715_p0), %s455_s7, 1024  }
 0x173   : > { %896 = vsyncadd (!%p715_p0), %s455_s7, 4294966272  ;;  %s19_s14 = sadd.s32 1, %s919_s14   ;;  %s1209_s9 = smov %s903_s10 }
 0x174   : > { %p16_p5 = scmp.ge.s32.totalorder %s19_s14, 4   ;;  %s1210_s10 = smov %s907_s11 }
 0x175   : > { %s1211_s11 = smov %s1051_s28  ;;  %s1212_s12 = smov %s915_s13 }
 0x176   : > { %s1213_s13 = smov %s1215_s25  ;;  %18 = sbr.rel (!%p16_p5) target bundleno = 7 (0x7), region = 77 }
 0x17d   :  { %460 = vsyncpa [#allocation3], 1 }
 0x17e   :  { %462 = vsyncpa [#allocation3 + $0x1], 1 }
 0x17f   :  { %463 = vsyncpa [#allocation6], 1 }
 0x180   :  { %464 = vsyncpa [#allocation4], 1 }
 0x181   :  { %466 = vsyncpa [#allocation4 + $0x1], 1 }

</bundles_post_ra>
